<compile_context>
chip_gen: v7x
topology: tpu7x:2x2x1
jax: 0.10.0
libtpu: 0.0.40
codegen_flags: <defaults>
</compile_context>

<pallas_src>
import functools

import jax
import jax.numpy as jnp
from jax.experimental import pallas as pl
from jax.experimental.pallas import tpu as pltpu


def _round_up(x: int, m: int) -> int:
    return ((x + m - 1) // m) * m


def _xavier_uniform(key, fan_in, fan_out, gain):
    # torch.nn.init.xavier_uniform_ with gain=calculate_gain('relu')=sqrt(2).
    # PyTorch weight shape is [out, in]; generate that and transpose to [in, out].
    limit = gain * jnp.sqrt(6.0 / (fan_in + fan_out))
    w_torch_layout = jax.random.uniform(
        key, (fan_out, fan_in), minval=-limit, maxval=limit, dtype=jnp.float32
    )
    return w_torch_layout.T  # [in, out]


def make_encoder_params(key, input_dim, code_dim):
    """Encoder: input_dim -> 512 -> 256 -> code_dim. Weights in [in, out] bf16."""
    gain = jnp.sqrt(2.0)  # nn.init.calculate_gain('relu')
    k1, k2, k3 = jax.random.split(key, 3)

    dout_p = _round_up(code_dim, 128)  # pad output dim -> lane-dense stores

    w1 = _xavier_uniform(k1, input_dim, 512, gain)       # [input_dim, 512]
    w2 = _xavier_uniform(k2, 512, 256, gain)              # [512, 256]
    w3 = _xavier_uniform(k3, 256, code_dim, gain)         # [256, code_dim]
    w3 = jnp.pad(w3, ((0, 0), (0, dout_p - code_dim)))    # zero cols, sliced off later

    # Biases are zero by spec (init() calls torch.nn.init.zeros_ on all biases).
    params = {
        "w1": w1.astype(jnp.bfloat16),                    # [input_dim, 512] bf16
        "b1": jnp.zeros((1, 512), jnp.float32),
        "w2": w2.astype(jnp.bfloat16),                    # [512, 256] bf16
        "b2": jnp.zeros((1, 256), jnp.float32),
        "w3": w3.astype(jnp.bfloat16),                    # [256, dout_p] bf16
        "b3": jnp.zeros((1, dout_p), jnp.float32),
    }
    return params


def _encoder_kernel(x_ref, w1_ref, b1_ref, w2_ref, b2_ref, w3_ref, b3_ref, o_ref):
    # Three bf16 MXU matmuls with f32 accumulation + VPU bias/relu, fused.
    # The bf16 cast of the f32 input happens here (VPU), not in the wrapper.
    x = x_ref[...].astype(jnp.bfloat16)                                # [bb, input_dim]
    h1 = jnp.dot(x, w1_ref[...], preferred_element_type=jnp.float32) + b1_ref[...]
    h1 = jnp.maximum(h1, 0.0).astype(jnp.bfloat16)                     # [bb, 512]
    h2 = jnp.dot(h1, w2_ref[...], preferred_element_type=jnp.float32) + b2_ref[...]
    h2 = jnp.maximum(h2, 0.0).astype(jnp.bfloat16)                     # [bb, 256]
    y = jnp.dot(h2, w3_ref[...], preferred_element_type=jnp.float32) + b3_ref[...]
    o_ref[...] = y.astype(o_ref.dtype)                                 # bf16 store


def _choose_tiling(batch: int, cap: int):
    """Pick (tile_rows, padded_batch): large tiles, even tile count, low padding."""
    b16 = _round_up(batch, 16)        # bf16 sublane packing
    if b16 <= 32:
        return b16, b16               # too small to split across cores
    n = 2                             # even tile count >= 2 (v7x megacore split)
    bb = _round_up(pl.cdiv(b16, n), 16)
    while bb > cap:
        n += 2
        bb = _round_up(pl.cdiv(b16, n), 16)
    return bb, n * bb


def _vmem_bytes_estimate(bb, input_dim, dout_p, param_bytes):
    # Per-batch-row VMEM: double-buffered x/out tiles + all fused intermediates.
    per_row = (
        2 * input_dim * 4        # x f32 tile (double-buffered)
        + input_dim * 2          # x bf16 cast
        + 512 * 4 + 512 * 2      # h1 f32 + bf16
        + 256 * 4 + 256 * 2      # h2 f32 + bf16
        + dout_p * 4             # y f32 accumulator
        + 2 * dout_p * 2         # out bf16 tile (double-buffered)
    )
    return bb * per_row + 2 * param_bytes + (2 << 20)   # weights 2x + slack


@functools.partial(jax.jit, static_argnames=("code_dim", "block_b_cap"))
def encoder_forward(x, params, *, code_dim, block_b_cap=2048):
    """x: [B, input_dim] float32 -> [B, code_dim] float32."""
    B, input_dim = x.shape
    dout_p = params["w3"].shape[1]

    # Large batch tiles (amortize ~0.35us/step overhead), even count for megacore,
    # capped so intermediates stay within VMEM on every TPU generation.
    bb, B_pad = _choose_tiling(B, block_b_cap)
    grid = (B_pad // bb,)

    # Only the ragged batch remainder is padded; no feature-dim pad, no wrapper cast.
    x_p = jnp.pad(x, ((0, B_pad - B), (0, 0))) if B_pad != B else x

    # Weights/biases: full-array blocks with constant index_map -> single DMA,
    # resident in VMEM across all batch tiles.
    def full(arr):
        return pl.BlockSpec(arr.shape, lambda i: (0,) * arr.ndim)

    param_bytes = sum(int(p.size) * p.dtype.itemsize for p in params.values())
    vmem_limit = int(
        min(max(_vmem_bytes_estimate(bb, input_dim, dout_p, param_bytes), 32 << 20),
            64 << 20)
    )

    flops = 2 * B_pad * (input_dim * 512 + 512 * 256 + 256 * dout_p)
    bytes_accessed = (
        x_p.size * 4            # f32 input read
        + param_bytes           # resident weights/biases (read once)
        + B_pad * dout_p * 2    # bf16 output writeback
    )

    y_pad = pl.pallas_call(
        _encoder_kernel,
        out_shape=jax.ShapeDtypeStruct((B_pad, dout_p), jnp.bfloat16),
        grid=grid,
        in_specs=[
            pl.BlockSpec((bb, input_dim), lambda i: (i, 0)),  # x tile (batch-parallel)
            full(params["w1"]),
            full(params["b1"]),
            full(params["w2"]),
            full(params["b2"]),
            full(params["w3"]),
            full(params["b3"]),
        ],
        out_specs=pl.BlockSpec((bb, dout_p), lambda i: (i, 0)),  # lane-dense bf16 out
        compiler_params=pltpu.CompilerParams(
            dimension_semantics=("parallel",),
            vmem_limit_bytes=vmem_limit,
        ),
        cost_estimate=pl.CostEstimate(
            flops=flops, transcendentals=0, bytes_accessed=bytes_accessed
        ),
    )(
        x_p,
        params["w1"], params["b1"],
        params["w2"], params["b2"],
        params["w3"], params["b3"],
    )
    # Slice off the lane padding / batch padding; f32 for interface parity.
    return y_pad[:B, :code_dim].astype(jnp.float32)


def encoder_forward_ref(x, params, code_dim):
    """Plain-JAX reference with identical bf16/f32 numerics."""
    xb = x.astype(jnp.bfloat16)
    h1 = jnp.dot(xb, params["w1"], preferred_element_type=jnp.float32) + params["b1"]
    h1 = jnp.maximum(h1, 0.0).astype(jnp.bfloat16)
    h2 = jnp.dot(h1, params["w2"], preferred_element_type=jnp.float32) + params["b2"]
    h2 = jnp.maximum(h2, 0.0).astype(jnp.bfloat16)
    y = jnp.dot(h2, params["w3"], preferred_element_type=jnp.float32) + params["b3"]
    return y[:, :code_dim].astype(jnp.bfloat16).astype(jnp.float32)


if __name__ == "__main__":
    key = jax.random.PRNGKey(0)
    k_param, k_x = jax.random.split(key)

    input_dim = 64   # encoder input dimension (e.g. flattened observation)
    code_dim = 32    # latent code dimension
    batch = 256      # splits into an even number of tiles -> both v7x TCs busy

    params = make_encoder_params(k_param, input_dim, code_dim)
    x = jax.random.normal(k_x, (batch, input_dim), dtype=jnp.float32)

    y = encoder_forward(x, params, code_dim=code_dim)
    y = jax.block_until_ready(y)

    y_ref = encoder_forward_ref(x, params, code_dim)
    assert y.shape == (batch, code_dim)
    assert jnp.allclose(y, y_ref, atol=1e-2, rtol=1e-2), "mismatch vs JAX reference"

    print("KERNEL_OK")
</pallas_src>

<mosaic_0001>
module attributes {stable_mosaic.version = 11 : i64} {
  func.func @_encoder_kernel(%arg0: i32, %arg1: memref<128x64xf32, #tpu.memory_space<vmem>>, %arg2: memref<64x512xbf16, #tpu.memory_space<vmem>>, %arg3: memref<1x512xf32, #tpu.memory_space<vmem>>, %arg4: memref<512x256xbf16, #tpu.memory_space<vmem>>, %arg5: memref<1x256xf32, #tpu.memory_space<vmem>>, %arg6: memref<256x128xbf16, #tpu.memory_space<vmem>>, %arg7: memref<1x128xf32, #tpu.memory_space<vmem>>, %arg8: memref<128x128xbf16, #tpu.memory_space<vmem>>) attributes {dimension_semantics = [#tpu.dimension_semantics<parallel>], iteration_bounds = array<i64: 2>, scalar_prefetch = 0 : i64, scratch_operands = 0 : i64, tpu.core_type = #tpu.core_type<tc>, window_params = [{transform_indices = @transform_0, window_bounds = array<i64: 128, 64>}, {pipeline_mode = #tpu.pipeline_mode<synchronous>, transform_indices = @transform_1, window_bounds = array<i64: 64, 512>}, {pipeline_mode = #tpu.pipeline_mode<synchronous>, transform_indices = @transform_2, window_bounds = array<i64: 1, 512>}, {pipeline_mode = #tpu.pipeline_mode<synchronous>, transform_indices = @transform_3, window_bounds = array<i64: 512, 256>}, {pipeline_mode = #tpu.pipeline_mode<synchronous>, transform_indices = @transform_4, window_bounds = array<i64: 1, 256>}, {pipeline_mode = #tpu.pipeline_mode<synchronous>, transform_indices = @transform_5, window_bounds = array<i64: 256, 128>}, {pipeline_mode = #tpu.pipeline_mode<synchronous>, transform_indices = @transform_6, window_bounds = array<i64: 1, 128>}, {transform_indices = @transform_7, window_bounds = array<i64: 128, 128>}]} {
    %c0 = arith.constant 0 : index
    %c0_0 = arith.constant 0 : index
    %0 = vector.load %arg1[%c0, %c0_0] : memref<128x64xf32, #tpu.memory_space<vmem>>, vector<128x64xf32>
    %1 = arith.truncf %0 : vector<128x64xf32> to vector<128x64xbf16>
    %c0_1 = arith.constant 0 : index
    %c0_2 = arith.constant 0 : index
    %2 = vector.load %arg2[%c0_1, %c0_2] : memref<64x512xbf16, #tpu.memory_space<vmem>>, vector<64x512xbf16>
    %cst = arith.constant dense<0.000000e+00> : vector<128x512xf32>
    %3 = tpu.matmul %1, %2, %cst {dimension_numbers = #tpu.dot_dimension_numbers<[1], [0], [0], [1], [0, 0, 1, 1], [], []>} : vector<128x64xbf16>, vector<64x512xbf16>, vector<128x512xf32> -> vector<128x512xf32>
    %c0_3 = arith.constant 0 : index
    %c0_4 = arith.constant 0 : index
    %4 = vector.load %arg3[%c0_3, %c0_4] : memref<1x512xf32, #tpu.memory_space<vmem>>, vector<1x512xf32>
    %5 = vector.broadcast %4 : vector<1x512xf32> to vector<128x512xf32>
    %6 = arith.addf %3, %5 : vector<128x512xf32>
    %cst_5 = arith.constant 0.000000e+00 : f32
    %7 = vector.broadcast %cst_5 : f32 to vector<128x512xf32>
    %8 = arith.maximumf %6, %7 : vector<128x512xf32>
    %9 = arith.truncf %8 : vector<128x512xf32> to vector<128x512xbf16>
    %c0_6 = arith.constant 0 : index
    %c0_7 = arith.constant 0 : index
    %10 = vector.load %arg4[%c0_6, %c0_7] : memref<512x256xbf16, #tpu.memory_space<vmem>>, vector<512x256xbf16>
    %cst_8 = arith.constant dense<0.000000e+00> : vector<128x256xf32>
    %11 = tpu.matmul %9, %10, %cst_8 {dimension_numbers = #tpu.dot_dimension_numbers<[1], [0], [0], [1], [0, 0, 1, 1], [], []>} : vector<128x512xbf16>, vector<512x256xbf16>, vector<128x256xf32> -> vector<128x256xf32>
    %c0_9 = arith.constant 0 : index
    %c0_10 = arith.constant 0 : index
    %12 = vector.load %arg5[%c0_9, %c0_10] : memref<1x256xf32, #tpu.memory_space<vmem>>, vector<1x256xf32>
    %13 = vector.broadcast %12 : vector<1x256xf32> to vector<128x256xf32>
    %14 = arith.addf %11, %13 : vector<128x256xf32>
    %cst_11 = arith.constant 0.000000e+00 : f32
    %15 = vector.broadcast %cst_11 : f32 to vector<128x256xf32>
    %16 = arith.maximumf %14, %15 : vector<128x256xf32>
    %17 = arith.truncf %16 : vector<128x256xf32> to vector<128x256xbf16>
    %c0_12 = arith.constant 0 : index
    %c0_13 = arith.constant 0 : index
    %18 = vector.load %arg6[%c0_12, %c0_13] : memref<256x128xbf16, #tpu.memory_space<vmem>>, vector<256x128xbf16>
    %cst_14 = arith.constant dense<0.000000e+00> : vector<128x128xf32>
    %19 = tpu.matmul %17, %18, %cst_14 {dimension_numbers = #tpu.dot_dimension_numbers<[1], [0], [0], [1], [0, 0, 1, 1], [], []>} : vector<128x256xbf16>, vector<256x128xbf16>, vector<128x128xf32> -> vector<128x128xf32>
    %c0_15 = arith.constant 0 : index
    %c0_16 = arith.constant 0 : index
    %20 = vector.load %arg7[%c0_15, %c0_16] : memref<1x128xf32, #tpu.memory_space<vmem>>, vector<1x128xf32>
    %21 = vector.broadcast %20 : vector<1x128xf32> to vector<128x128xf32>
    %22 = arith.addf %19, %21 : vector<128x128xf32>
    %23 = arith.truncf %22 : vector<128x128xf32> to vector<128x128xbf16>
    %c0_17 = arith.constant 0 : index
    %c0_18 = arith.constant 0 : index
    %24 = vector.load %arg8[%c0_17, %c0_18] : memref<128x128xbf16, #tpu.memory_space<vmem>>, vector<128x128xbf16>
    tpu.vector_store %arg8[%c0_17, %c0_18], %23 {strides = array<i32>} : memref<128x128xbf16, #tpu.memory_space<vmem>>, vector<128x128xbf16>,
    return
  }
  func.func @transform_0(%arg0: i32) -> (i32, i32) {
    %c0_i32 = arith.constant 0 : i32
    %c0_i32_0 = arith.constant 0 : i32
    return %arg0, %c0_i32 : i32, i32
  }
  func.func @transform_1(%arg0: i32) -> (i32, i32) {
    %c0_i32 = arith.constant 0 : i32
    %c0_i32_0 = arith.constant 0 : i32
    %c0_i32_1 = arith.constant 0 : i32
    return %c0_i32, %c0_i32_0 : i32, i32
  }
  func.func @transform_2(%arg0: i32) -> (i32, i32) {
    %c0_i32 = arith.constant 0 : i32
    %c0_i32_0 = arith.constant 0 : i32
    %c0_i32_1 = arith.constant 0 : i32
    return %c0_i32, %c0_i32_0 : i32, i32
  }
  func.func @transform_3(%arg0: i32) -> (i32, i32) {
    %c0_i32 = arith.constant 0 : i32
    %c0_i32_0 = arith.constant 0 : i32
    %c0_i32_1 = arith.constant 0 : i32
    return %c0_i32, %c0_i32_0 : i32, i32
  }
  func.func @transform_4(%arg0: i32) -> (i32, i32) {
    %c0_i32 = arith.constant 0 : i32
    %c0_i32_0 = arith.constant 0 : i32
    %c0_i32_1 = arith.constant 0 : i32
    return %c0_i32, %c0_i32_0 : i32, i32
  }
  func.func @transform_5(%arg0: i32) -> (i32, i32) {
    %c0_i32 = arith.constant 0 : i32
    %c0_i32_0 = arith.constant 0 : i32
    %c0_i32_1 = arith.constant 0 : i32
    return %c0_i32, %c0_i32_0 : i32, i32
  }
  func.func @transform_6(%arg0: i32) -> (i32, i32) {
    %c0_i32 = arith.constant 0 : i32
    %c0_i32_0 = arith.constant 0 : i32
    %c0_i32_1 = arith.constant 0 : i32
    return %c0_i32, %c0_i32_0 : i32, i32
  }
  func.func @transform_7(%arg0: i32) -> (i32, i32) {
    %c0_i32 = arith.constant 0 : i32
    %c0_i32_0 = arith.constant 0 : i32
    return %arg0, %c0_i32 : i32, i32
  }
}

</mosaic_0001>

<bundles_post_ra>
// kernel: encoder_forward.1
= control target key start
LH: loop header
LB: loop body
LE: loop exit
PB: predicated region body
PF: predicated region fallthrough
CT: control target
= control target key end

     0   :  { %12 = vsyncpa [#allocation3], 0  ;;  %s2444_s24 = smov 0   ;;  %s2988_s0 = inlined_call_operand.vmem [shape: f32[256,64], index: 0, kind: input, shape index: {}]   ;;  %s2989_s1 = inlined_call_operand.vmem [shape: bf16[64,512], index: 1, kind: input, shape index: {}]   ;;  %s2990_s2 = inlined_call_operand.vmem [shape: f32[1,512], index: 2, kind: input, shape index: {}]   ;;  %s2991_s3 = inlined_call_operand.hbm [shape: bf16[512,256], index: 3, kind: input, shape index: {}]   ;;  %s2992_s4 = inlined_call_operand.vmem [shape: f32[1,256], index: 4, kind: input, shape index: {}]   ;;  %s2993_s5 = inlined_call_operand.vmem [shape: bf16[256,128], index: 5, kind: input, shape index: {}]   ;;  %s2994_s6 = inlined_call_operand.vmem [shape: f32[1,128], index: 6, kind: input, shape index: {}]   ;;  %s2995_s7 = inlined_call_operand.vmem [shape: bf16[256,128], index: 7, kind: output, shape index: {}]  }
   0x1 LB: > { %s1837_s25 = sadd.s32 4294967295, %s2398_s24   ;;  %p1839_p0 = scmp.ge.s32.totalorder %s2398_s24, 1  ;;  %s2398_s24 = sphi %s2444_s24, %s18_s24  }
   0x2   : > { %p201_p1 = scmp.lt.s32.totalorder %s2398_s24, 3  ;;  %s2400_s26 = smov [#allocation2]  }
   0x3   : > { %s219_s27 = sshll.u32 %s2400_s26, 4  ;;  %p2458_p3 = scmp.eq.s32.totalorder %s1837_s25, 0  ;;  %s220_s27 = int_to_ptr.vmem [resolvable:$true] %s219_s27 }
   0x4   : > { %p2452_p2 = pnand %p1839_p0, %p201_p1  ;;  %s2360_s10 = scalar_lea.hbm %s2991_s3, 8192 }
   0x5   : > { %s3000_s29 = scalar_select %p2458_p3, 1, 0 }
   0x6   : > { %s2999_s28 = scalar_select %p2452_p2, 1, 0 }
   0x7   : > { %p2206_p4 = pneg %p2452_p2  ;;  %p2361_p6 = scmp.ne.s32.totalorder %s2991_s3, %s2360_s10 }
   0x8   : > { %p2367_p10 = scmp.lt.u32.totalorder %s2360_s10, %s2991_s3 }
   0x9   : > { %p2466_p5 = pnand %p2458_p3, %p2206_p4 }
   0xb   : > { %p2362_p7 = pneg %p2466_p5 }
   0xd   : > { %p2363_p8 = pnand %p2362_p7, %p2361_p6 }
   0xf   : > { %p2364_p9 = pneg %p2363_p8 }
  0x11   : > { %p2369_p11 = pnand %p2367_p10, %p2364_p9 }
  0x13   : > { %2372 = shalt.err (!%p2369_p11)
}
  0x14   : > { %s2373_s15 = scalar_lea.vmem %s220_s27, 8192  ;;  %p2381_p1 = scmp.lt.s32.totalorder %s220_s27, %s220_s27 }
  0x15   : > { %p2374_p12 = scmp.ne.s32.totalorder %s220_s27, %s2373_s15  ;;  %p2382_p4 = scmp.lt.s32.totalorder %s2373_s15, %s2373_s15 }
  0x17   : > { %p2376_p13 = pnand %p2374_p12, %p2362_p7  ;;  %p2383_p3 = por %p2382_p4, %p2381_p1 }
  0x19   : > { %p2377_p0 = pneg %p2376_p13 }
  0x1b   : > { %p2384_p2 = pnand %p2383_p3, %p2377_p0 }
  0x1d   : > { %2387 = shalt.err (!%p2384_p2)
}
  0x1e   : > { %s2401_s16 = smov 128   ;;  %s2402_s17 = smov 8  }
  0x1f   : > { %2209 = dma.hbm_to_vmem [thread:$0]  (!%p2466_p5), %s2991_s3, 8192, %s220_s27, [#allocation3], %s2401_s16, %s2401_s16, %s2402_s17  }
  0x20   : > { %p3002_p6 = scmp.ne.s32.totalorder %s2999_s28, 0 }
  0x21   : > { %p3003_p8 = scmp.ne.s32.totalorder (!%p3002_p6), %s3000_s29, 0 }
  0x22   : > { %253 = sbr.rel (%p3002_p6) target bundleno = 846 (0x34e), region = 48 }
  0x29   : > { %2393 = dma.done.wait (%p3003_p8), [#allocation3], 8192  }
  0x2a   : > { %2395 = vsyncadd (%p3003_p8), [#allocation3], 4294959104  ;;  %v2403_v0 = vmov 0   ;;  %s1844_s20 = sshll.u32 %s1837_s25, 4  ;;  %v2224_v1 = vld [vmem:[%s2989_s1 + $0x4] ss:$16 sps:$4 sm:$0xff]  }
  0x2b   : > { %497 = vmatprep.mubr.bf16.mxu0 %v2403_v0  ;;  %610 = vmatprep.mubr.bf16.mxu1 %v2403_v0  ;;  %p286_p2 = scmp.lt.s32.totalorder %s1844_s20, 31  ;;  %v2226_v2 = vld [vmem:[%s2989_s1] ss:$16 sps:$4 sm:$0xff]   ;;  %v2227_v3 = vld [vmem:[%s2989_s1 + $0xc] ss:$16 sps:$4 sm:$0xff]   ;;  %vm440_vm0 = vcmask 523264  }
  0x2c   : > { %465 = vmatprep.subr.bf16.mxu0 %v2224_v1  ;;  %v2229_v4 = vld [vmem:[%s2989_s1 + $0x8] ss:$16 sps:$4 sm:$0xff]   ;;  %v2230_v5 = vld [vmem:[%s2989_s1 + $0x24] ss:$16 sps:$4 sm:$0xff]   ;;  %v2232_v6 = vld [vmem:[%s2989_s1 + $0x20] ss:$16 sps:$4 sm:$0xff]   ;;  %578 = vmatprep.subr.bf16.mxu1 %v2227_v3 }
  0x2d   : > { %s3005_s20 = smov (!%p286_p2, %s1844_s20), 31  ;;  %466 = vmatpush1.bf16.msra.mxu0 %v2226_v2  ;;  %v2233_v7 = vld [vmem:[%s2989_s1 + $0x2c] ss:$16 sps:$4 sm:$0xff]   ;;  %579 = vmatpush1.bf16.msra.mxu1 %v2229_v4  ;;  %v2235_v8 = vld [vmem:[%s2989_s1 + $0x28] ss:$16 sps:$4 sm:$0xff]  }
  0x2e   : > { %467 = vmatprep.subr.bf16.mxu0 %v2230_v5  ;;  %s1845_s15 = sshll.u32 %s3005_s20, 3  ;;  %580 = vmatprep.subr.bf16.mxu1 %v2233_v7  ;;  %v2236_v9 = vld [vmem:[%s2989_s1 + $0x44] ss:$16 sps:$4 sm:$0xff]   ;;  %v2238_v10 = vld [vmem:[%s2989_s1 + $0x40] ss:$16 sps:$4 sm:$0xff]   ;;  %s1847_s10 = sshll.u32 %s3005_s20, 2 }
  0x2f   : > { %v2239_v11 = vld [vmem:[%s2989_s1 + $0x4c] ss:$16 sps:$4 sm:$0xff]   ;;  %v2242_v12 = vld [vmem:[%s2989_s1 + $0x64] ss:$16 sps:$4 sm:$0xff]   ;;  %s2538_s25 = scalar_lea.vmem %s2988_s0, %s1845_s15  ;;  %v2241_v13 = vld [vmem:[%s2989_s1 + $0x48] ss:$16 sps:$4 sm:$0xff]   ;;  %s2961_s13 = scalar_lea.vmem %s2995_s7, %s1847_s10 }
  0x30   : > { %v2245_v14 = vld [vmem:[%s2989_s1 + $0x6c] ss:$16 sps:$4 sm:$0xff]   ;;  %v2244_v15 = vld [vmem:[%s2989_s1 + $0x60] ss:$16 sps:$4 sm:$0xff]   ;;  %v2247_v18 = vld [vmem:[%s2989_s1 + $0x68] ss:$16 sps:$4 sm:$0xff]  }
  0x31   : > { %468 = vmatpush1.bf16.msra.mxu0 %v2232_v6  ;;  %581 = vmatpush1.bf16.msra.mxu1 %v2235_v8  ;;  %v298_v16 = vld [vmem:[%s2538_s25] sm:$0xff]  ;;  %v299_v17 = vld [vmem:[%s2538_s25 + $0x8] sm:$0xff]  ;;  %v2253_v22 = vld [vmem:[#allocation2 + $0x14] ss:$8 sps:$4 sm:$0xff]  }
  0x32   : > { %469 = vmatprep.subr.bf16.mxu0 %v2236_v9  ;;  %582 = vmatprep.subr.bf16.mxu1 %v2239_v11  ;;  %v314_v19 = vpack.c.bf16 %v299_v17, %v298_v16  ;;  %v2248_v20 = vld [vmem:[#allocation2] ss:$8 sps:$4 sm:$0xff]   ;;  %v2250_v21 = vld [vmem:[#allocation2 + $0x4] ss:$8 sps:$4 sm:$0xff]   ;;  %v300_v23 = vld [vmem:[%s2538_s25 + $0x10] sm:$0xff] }
  0x33   : > { %v301_v24 = vld [vmem:[%s2538_s25 + $0x18] sm:$0xff]  ;;  %v2256_v26 = vld [vmem:[#allocation2 + $0x24] ss:$8 sps:$4 sm:$0xff]   ;;  %v2254_v28 = vld [vmem:[#allocation2 + $0x20] ss:$8 sps:$4 sm:$0xff]  }
  0x34   : > { %v2251_v25 = vld [vmem:[#allocation2 + $0x10] ss:$8 sps:$4 sm:$0xff]   ;;  %v315_v27 = vpack.c.bf16 %v301_v24, %v300_v23  ;;  %v2259_v29 = vld [vmem:[#allocation2 + $0x34] ss:$8 sps:$4 sm:$0xff]   ;;  %v302_v30 = vld [vmem:[%s2538_s25 + $0x20] sm:$0xff] }
  0x35   : > { %470 = vmatpush1.bf16.msra.mxu0 %v2238_v10  ;;  %583 = vmatpush1.bf16.msra.mxu1 %v2241_v13  ;;  %v303_v31 = vld [vmem:[%s2538_s25 + $0x28] sm:$0xff]  ;;  %v2257_v32 = vld [vmem:[#allocation2 + $0x30] ss:$8 sps:$4 sm:$0xff]   ;;  %v2571_v37 = vld [vmem:[#allocation2 + $0x114] ss:$8 sps:$4 sm:$0xff]  }
  0x36   : > { %471 = vmatprep.subr.bf16.mxu0 %v2242_v12  ;;  %584 = vmatprep.subr.bf16.mxu1 %v2245_v14  ;;  %v2262_v33 = vld [vmem:[#allocation2 + $0x44] ss:$8 sps:$4 sm:$0xff]   ;;  %v2565_v34 = vld [vmem:[#allocation2 + $0x100] ss:$8 sps:$4 sm:$0xff]   ;;  %v316_v36 = vpack.c.bf16 %v303_v31, %v302_v30  ;;  %v2265_v39 = vld [vmem:[#allocation2 + $0x54] ss:$8 sps:$4 sm:$0xff]  }
  0x37   : > { %v2568_v35 = vld [vmem:[#allocation2 + $0x104] ss:$8 sps:$4 sm:$0xff]   ;;  %v2260_v38 = vld [vmem:[#allocation2 + $0x40] ss:$8 sps:$4 sm:$0xff]   ;;  %v304_v40 = vld [vmem:[%s2538_s25 + $0x30] sm:$0xff] }
  0x38   : > { %v2577_v41 = vld [vmem:[#allocation2 + $0x110] ss:$8 sps:$4 sm:$0xff]   ;;  %v2581_v43 = vld [vmem:[#allocation2 + $0x124] ss:$8 sps:$4 sm:$0xff]   ;;  %v2586_v47 = vld [vmem:[#allocation2 + $0x120] ss:$8 sps:$4 sm:$0xff]  }
  0x39   : > { %472 = vmatpush1.bf16.msra.mxu0 %v2244_v15  ;;  %585 = vmatpush1.bf16.msra.mxu1 %v2247_v18  ;;  %v305_v42 = vld [vmem:[%s2538_s25 + $0x38] sm:$0xff]  ;;  %v2268_v45 = vld [vmem:[#allocation2 + $0x64] ss:$8 sps:$4 sm:$0xff]   ;;  %v2266_v48 = vld [vmem:[#allocation2 + $0x60] ss:$8 sps:$4 sm:$0xff]  }
  0x3a   : > { %1183 = vmatprep.subr.bf16.mxu0 %v2250_v21  ;;  %2106 = vmatprep.subr.bf16.mxu1 %v2568_v35  ;;  %v2263_v44 = vld [vmem:[#allocation2 + $0x50] ss:$8 sps:$4 sm:$0xff]   ;;  %v317_v46 = vpack.c.bf16 %v305_v42, %v304_v40  ;;  %v2589_v49 = vld [vmem:[#allocation2 + $0x134] ss:$8 sps:$4 sm:$0xff]   ;;  %v306_v51 = vld [vmem:[%s2538_s25 + $0x40] sm:$0xff] }
  0x3b   : > { %v2271_v50 = vld [vmem:[#allocation2 + $0x74] ss:$8 sps:$4 sm:$0xff]   ;;  %v307_v52 = vld [vmem:[%s2538_s25 + $0x48] sm:$0xff]  ;;  %v2593_v53 = vld [vmem:[#allocation2 + $0x130] ss:$8 sps:$4 sm:$0xff]  }
  0x3c   : > { %1864 = vmatmul.mubr.msk.bf16.vlgmr.msra.gmra.mrb[0].mxu0 %vm440_vm0, %v314_v19  ;;  %1872 = vmatmul.mubr.msk.bf16.vlgmr.msra.gmra.mrb[0].mxu1 %vm440_vm0, %v314_v19  ;;  %v2595_v54 = vld [vmem:[#allocation2 + $0x144] ss:$8 sps:$4 sm:$0xff]   ;;  %v2269_v55 = vld [vmem:[#allocation2 + $0x70] ss:$8 sps:$4 sm:$0xff]   ;;  %v2602_v57 = vld [vmem:[#allocation2 + $0x140] ss:$8 sps:$4 sm:$0xff]   ;;  %v318_v58 = vpack.c.bf16 %v307_v52, %v306_v51 }
  0x3d   : > { %507 = vmatprep.mubr.bf16.mxu0 %v2403_v0  ;;  %1184 = vmatpush1.bf16.msra.mxu0 %v2248_v20  ;;  %v2274_v56 = vld [vmem:[#allocation2 + $0x84] ss:$8 sps:$4 sm:$0xff]   ;;  %v2272_v59 = vld [vmem:[#allocation2 + $0x80] ss:$8 sps:$4 sm:$0xff]   ;;  %v2280_v60 = vld [vmem:[#allocation2 + $0x94] ss:$8 sps:$4 sm:$0xff]  }
  0x3e   : > { %620 = vmatprep.mubr.bf16.mxu1 %v2403_v0  ;;  %1185 = vmatprep.subr.bf16.mxu0 %v2253_v22  ;;  %v308_v61 = vld [vmem:[%s2538_s25 + $0x50] sm:$0xff]  ;;  %v309_v62 = vld [vmem:[%s2538_s25 + $0x58] sm:$0xff]  ;;  %v2286_v1 = vld [vmem:[#allocation2 + $0xa4] ss:$8 sps:$4 sm:$0xff]  }
  0x3f   : > { %2122 = vmatpush1.bf16.msra.mxu1 %v2565_v34  ;;  %v2278_v63 = vld [vmem:[#allocation2 + $0x90] ss:$8 sps:$4 sm:$0xff]   ;;  %v319_v2 = vpack.c.bf16 %v309_v62, %v308_v61  ;;  %v2284_v3 = vld [vmem:[#allocation2 + $0xa0] ss:$8 sps:$4 sm:$0xff]   ;;  %v2292_v4 = vld [vmem:[#allocation2 + $0xb4] ss:$8 sps:$4 sm:$0xff]  }
  0x40   : > { %2107 = vmatprep.subr.bf16.mxu1 %v2571_v37  ;;  %v310_v5 = vld [vmem:[%s2538_s25 + $0x60] sm:$0xff]  ;;  %v311_v6 = vld [vmem:[%s2538_s25 + $0x68] sm:$0xff]  ;;  %v2290_v7 = vld [vmem:[#allocation2 + $0xb0] ss:$8 sps:$4 sm:$0xff]  }
  0x41   : > { %1186 = vmatpush1.bf16.msra.mxu0 %v2251_v25  ;;  %v2298_v8 = vld [vmem:[#allocation2 + $0xc4] ss:$8 sps:$4 sm:$0xff]   ;;  %v320_v9 = vpack.c.bf16 %v311_v6, %v310_v5  ;;  %v2296_v10 = vld [vmem:[#allocation2 + $0xc0] ss:$8 sps:$4 sm:$0xff]   ;;  %v2304_v11 = vld [vmem:[#allocation2 + $0xd4] ss:$8 sps:$4 sm:$0xff]  }
  0x42   : > { %1187 = vmatprep.subr.bf16.mxu0 %v2256_v26  ;;  %v312_v12 = vld [vmem:[%s2538_s25 + $0x70] sm:$0xff]  ;;  %v313_v13 = vld [vmem:[%s2538_s25 + $0x78] sm:$0xff]  ;;  %v2310_v18 = vld [vmem:[#allocation2 + $0xe4] ss:$8 sps:$4 sm:$0xff]  }
  0x43   : > { %2123 = vmatpush1.bf16.msra.mxu1 %v2577_v41  ;;  %v2302_v14 = vld [vmem:[#allocation2 + $0xd0] ss:$8 sps:$4 sm:$0xff]   ;;  %v321_v15 = vpack.c.bf16 %v313_v13, %v312_v12  ;;  %v2628_v16 = vld [vmem:[#allocation2 + $0x154] ss:$8 sps:$4 sm:$0xff]   ;;  %v2308_v19 = vld [vmem:[#allocation2 + $0xe0] ss:$8 sps:$4 sm:$0xff]  }
  0x44   : > { %1865 = vmatmul.mubr.msk.bf16.gmra.mrb[4].mxu0 %vm440_vm0, %v315_v27  ;;  %1873 = vmatmul.mubr.msk.bf16.gmra.mrb[4].mxu1 %vm440_vm0, %v315_v27  ;;  %v2630_v17 = vld [vmem:[#allocation2 + $0x150] ss:$8 sps:$4 sm:$0xff]   ;;  %v2634_v20 = vld [vmem:[#allocation2 + $0x164] ss:$8 sps:$4 sm:$0xff]   ;;  %v2316_v21 = vld [vmem:[#allocation2 + $0xf4] ss:$8 sps:$4 sm:$0xff]  }
  0x45   : > { %517 = vmatprep.mubr.bf16.mxu0 %v2403_v0  ;;  %1188 = vmatpush1.bf16.msra.mxu0 %v2254_v28  ;;  %v2314_v22 = vld [vmem:[#allocation2 + $0xf0] ss:$8 sps:$4 sm:$0xff]   ;;  %v2640_v23 = vld [vmem:[#allocation2 + $0x174] ss:$8 sps:$4 sm:$0xff]   ;;  %v2647_v25 = vld [vmem:[#allocation2 + $0x184] ss:$8 sps:$4 sm:$0xff]  }
  0x46   : > { %630 = vmatprep.mubr.bf16.mxu1 %v2403_v0  ;;  %1189 = vmatprep.subr.bf16.mxu0 %v2259_v29  ;;  %v2642_v24 = vld [vmem:[#allocation2 + $0x170] ss:$8 sps:$4 sm:$0xff]   ;;  %v2649_v26 = vld [vmem:[#allocation2 + $0x180] ss:$8 sps:$4 sm:$0xff]   ;;  %v2653_v27 = vld [vmem:[#allocation2 + $0x194] ss:$8 sps:$4 sm:$0xff]  }
  0x47   : > { %2108 = vmatprep.subr.bf16.mxu1 %v2581_v43  ;;  %v2655_v28 = vld [vmem:[#allocation2 + $0x190] ss:$8 sps:$4 sm:$0xff]   ;;  %v2659_v29 = vld [vmem:[#allocation2 + $0x1a4] ss:$8 sps:$4 sm:$0xff]   ;;  %v2661_v30 = vld [vmem:[#allocation2 + $0x1a0] ss:$8 sps:$4 sm:$0xff]  }
  0x48   : > { %2124 = vmatpush1.bf16.msra.mxu1 %v2586_v47  ;;  %v2665_v31 = vld [vmem:[#allocation2 + $0x1b4] ss:$8 sps:$4 sm:$0xff]   ;;  %v2685_v40 = vld [vmem:[#allocation2 + $0x1e0] ss:$8 sps:$4 sm:$0xff]  }
  0x49   : > { %1190 = vmatpush1.bf16.msra.mxu0 %v2257_v32  ;;  %2109 = vmatprep.subr.bf16.mxu1 %v2589_v49  ;;  %v2667_v32 = vld [vmem:[#allocation2 + $0x1b0] ss:$8 sps:$4 sm:$0xff]   ;;  %v2689_v42 = vld [vmem:[#allocation2 + $0x1f4] ss:$8 sps:$4 sm:$0xff]  }
  0x4a   : > { %1191 = vmatprep.subr.bf16.mxu0 %v2262_v33  ;;  %v2671_v33 = vld [vmem:[#allocation2 + $0x1c4] ss:$8 sps:$4 sm:$0xff]  }
  0x4c   : > { %1866 = vmatmul.mubr.msk.bf16.gmra.mrb[8].mxu0 %vm440_vm0, %v316_v36  ;;  %1874 = vmatmul.mubr.msk.bf16.gmra.mrb[8].mxu1 %vm440_vm0, %v316_v36  ;;  %v2677_v36 = vld [vmem:[#allocation2 + $0x1d4] ss:$8 sps:$4 sm:$0xff]  }
  0x4d   : > { %527 = vmatprep.mubr.bf16.mxu0 %v2403_v0  ;;  %1192 = vmatpush1.bf16.msra.mxu0 %v2260_v38  ;;  %v2679_v38 = vld [vmem:[#allocation2 + $0x1d0] ss:$8 sps:$4 sm:$0xff]  }
  0x4e   : > { %640 = vmatprep.mubr.bf16.mxu1 %v2403_v0  ;;  %1193 = vmatprep.subr.bf16.mxu0 %v2265_v39  ;;  %v2683_v39 = vld [vmem:[#allocation2 + $0x1e4] ss:$8 sps:$4 sm:$0xff]  }
  0x4f   : > { %2125 = vmatpush1.bf16.msra.mxu1 %v2593_v53 }
  0x50   : > { %2110 = vmatprep.subr.bf16.mxu1 %v2595_v54 }
  0x51   : > { %1194 = vmatpush1.bf16.msra.mxu0 %v2263_v44  ;;  %v2691_v44 = vld [vmem:[#allocation2 + $0x1f0] ss:$8 sps:$4 sm:$0xff]  }
  0x52   : > { %1195 = vmatprep.subr.bf16.mxu0 %v2268_v45  ;;  %v340_v45 = vlaneseq }
  0x53   : > { %2126 = vmatpush1.bf16.msra.mxu1 %v2602_v57 }
  0x54   : > { %1867 = vmatmul.mubr.msk.bf16.gmra.mrb[12].mxu0 %vm440_vm0, %v317_v46  ;;  %1875 = vmatmul.mubr.msk.bf16.gmra.mrb[12].mxu1 %vm440_vm0, %v317_v46  ;;  %v2695_v46 = vshrl.u32 %v340_v45, 7 }
  0x55   : > { %537 = vmatprep.mubr.bf16.mxu0 %v2403_v0  ;;  %1196 = vmatpush1.bf16.msra.mxu0 %v2266_v48 }
  0x56   : > { %650 = vmatprep.mubr.bf16.mxu1 %v2403_v0  ;;  %1197 = vmatprep.subr.bf16.mxu0 %v2271_v50  ;;  %v342_v48 = vsub.s32 0, %v2695_v46  ;;  %v338_v50 = vld [vmem:[%s2990_s2] sm:$0xf]  ;;  %v346_v51 = vsub.s32 1, %v2695_v46 }
  0x57   : > { %2111 = vmatprep.subr.bf16.mxu1 %v2628_v16 }
  0x58   : > { %2127 = vmatpush1.bf16.msra.mxu1 %v2630_v17  ;;  %v2704_v52 = vrot.slane %v338_v50, %v342_v48 }
  0x59   : > { %1198 = vmatpush1.bf16.msra.mxu0 %v2269_v55  ;;  %2112 = vmatprep.subr.bf16.mxu1 %v2634_v20  ;;  %v350_v55 = vsub.s32 2, %v2695_v46 }
  0x5a   : > { %1199 = vmatprep.subr.bf16.mxu0 %v2274_v56  ;;  %v2709_v56 = vrot.slane %v338_v50, %v346_v51 }
  0x5b   : > { %v2713_v62 = vrot.slane %v338_v50, %v350_v55 }
  0x5c   : > { %1868 = vmatmul.mubr.msk.bf16.gmra.mrb[16].mxu0 %vm440_vm0, %v318_v58  ;;  %1876 = vmatmul.mubr.msk.bf16.gmra.mrb[16].mxu1 %vm440_vm0, %v318_v58  ;;  %v354_v58 = vsub.s32 3, %v2695_v46 }
  0x5d   : > { %547 = vmatprep.mubr.bf16.mxu0 %v2403_v0  ;;  %1200 = vmatpush1.bf16.msra.mxu0 %v2272_v59 }
  0x5e   : > { %660 = vmatprep.mubr.bf16.mxu1 %v2403_v0  ;;  %1201 = vmatprep.subr.bf16.mxu0 %v2280_v60 }
  0x61   : > { %1202 = vmatpush1.bf16.msra.mxu0 %v2278_v63 }
  0x62   : > { %1203 = vmatprep.subr.bf16.mxu0 %v2286_v1 }
  0x64   : > { %1869 = vmatmul.mubr.msk.bf16.gmra.mrb[20].mxu0 %vm440_vm0, %v319_v2  ;;  %1877 = vmatmul.mubr.msk.bf16.gmra.mrb[20].mxu1 %vm440_vm0, %v319_v2 }
  0x65   : > { %557 = vmatprep.mubr.bf16.mxu0 %v2403_v0  ;;  %1204 = vmatpush1.bf16.msra.mxu0 %v2284_v3  ;;  %v2716_v3 = vrot.slane %v338_v50, %v354_v58 }
  0x66   : > { %670 = vmatprep.mubr.bf16.mxu1 %v2403_v0  ;;  %1205 = vmatprep.subr.bf16.mxu0 %v2292_v4 }
  0x69   : > { %1206 = vmatpush1.bf16.msra.mxu0 %v2290_v7 }
  0x6a   : > { %1207 = vmatprep.subr.bf16.mxu0 %v2298_v8 }
  0x6c   : > { %1870 = vmatmul.mubr.msk.bf16.gmra.mrb[24].mxu0 %vm440_vm0, %v320_v9  ;;  %1878 = vmatmul.mubr.msk.bf16.gmra.mrb[24].mxu1 %vm440_vm0, %v320_v9 }
  0x6d   : > { %567 = vmatprep.mubr.bf16.mxu0 %v2403_v0  ;;  %1208 = vmatpush1.bf16.msra.mxu0 %v2296_v10 }
  0x6e   : > { %680 = vmatprep.mubr.bf16.mxu1 %v2403_v0  ;;  %1209 = vmatprep.subr.bf16.mxu0 %v2304_v11  ;;  %v2636_v0 = vld [vmem:[#allocation2 + $0x160] ss:$8 sps:$4 sm:$0xff]  }
  0x6f   : > { %2128 = vmatpush1.bf16.msra.mxu1 %v2636_v0 }
  0x70   : > { %2113 = vmatprep.subr.bf16.mxu1 %v2640_v23 }
  0x71   : > { %1210 = vmatpush1.bf16.msra.mxu0 %v2302_v14 }
  0x72   : > { %1211 = vmatprep.subr.bf16.mxu0 %v2310_v18 }
  0x73   : > { %2129 = vmatpush1.bf16.msra.mxu1 %v2642_v24 }
  0x74   : > { %1871 = vmatmul.mubr.msk.bf16.gmra.mrb[28].mxu0 %vm440_vm0, %v321_v15  ;;  %1879 = vmatmul.mubr.msk.bf16.gmra.mrb[28].mxu1 %vm440_vm0, %v321_v15 }
  0x75   : > { %1212 = vmatpush1.bf16.msra.mxu0 %v2308_v19  ;;  %2114 = vmatprep.subr.bf16.mxu1 %v2647_v25 }
  0x76   : > { %1213 = vmatprep.subr.bf16.mxu0 %v2316_v21 }
  0x77   : > { %2130 = vmatpush1.bf16.msra.mxu1 %v2649_v26 }
  0x78   : > { %2115 = vmatprep.subr.bf16.mxu1 %v2653_v27 }
  0x79   : > { %1214 = vmatpush1.bf16.msra.mxu0 %v2314_v22 }
  0x7a   : > { %1296 = vmatprep.subr.bf16.mxu0 %v2568_v35  ;;  %v2673_v35 = vld [vmem:[#allocation2 + $0x1c0] ss:$8 sps:$4 sm:$0xff]  }
  0x7b   : > { %2131 = vmatpush1.bf16.msra.mxu1 %v2655_v28 }
  0x7c   : > { %2116 = vmatprep.subr.bf16.mxu1 %v2659_v29 }
  0x7f   : > { %2132 = vmatpush1.bf16.msra.mxu1 %v2661_v30 }
  0x80   : > { %2117 = vmatprep.subr.bf16.mxu1 %v2665_v31 }
  0x83   : > { %2133 = vmatpush1.bf16.msra.mxu1 %v2667_v32 }
  0x84   : > { %2118 = vmatprep.subr.bf16.mxu1 %v2671_v33 }
  0x87   : > { %2134 = vmatpush1.bf16.msra.mxu1 %v2673_v35 }
  0x88   : > { %2119 = vmatprep.subr.bf16.mxu1 %v2677_v36 }
  0x8b   : > { %2135 = vmatpush1.bf16.msra.mxu1 %v2679_v38 }
  0x8c   : > { %2120 = vmatprep.subr.bf16.mxu1 %v2683_v39 }
  0x8f   : > { %2136 = vmatpush1.bf16.msra.mxu1 %v2685_v40 }
  0x90   : > { %2121 = vmatprep.subr.bf16.mxu1 %v2689_v42 }
  0x93   : > { %2137 = vmatpush1.bf16.msra.mxu1 %v2691_v44 }
 0x10f   : > { %v499_v59 = vpop.f32.mrb[0].mxu0  ;;  %v612_v2 = vpop.f32.mrb[0].mxu1 }
 0x110   : > { %v500_v60 = vadd.f32 %v499_v59, %v2704_v52  ;;  %v501_v61 = vpop.f32.mrb[1].mxu0  ;;  %v613_v6 = vadd.f32 %v612_v2, %v2713_v62  ;;  %v614_v7 = vpop.f32.mrb[1].mxu1 }
 0x111   : > { %v502_v63 = vadd.f32 %v501_v61, %v2709_v56  ;;  %v503_v1 = vpop.f32.mrb[2].mxu0  ;;  %v615_v9 = vadd.f32 %v614_v7, %v2716_v3  ;;  %v616_v10 = vpop.f32.mrb[2].mxu1 }
 0x112   : > { %v504_v4 = vadd.f32 %v503_v1, %v2704_v52  ;;  %v505_v5 = vpop.f32.mrb[3].mxu0  ;;  %v691_v11 = vmax.f32 %v500_v60, 0.0  ;;  %v693_v13 = vmax.f32 %v613_v6, 0.0  ;;  %v617_v14 = vadd.f32 %v616_v10, %v2713_v62  ;;  %v618_v15 = vpop.f32.mrb[3].mxu1 }
 0x113   : > { %v506_v8 = vadd.f32 %v505_v5, %v2709_v56  ;;  %v692_v18 = vmax.f32 %v502_v63, 0.0  ;;  %v694_v21 = vmax.f32 %v615_v9, 0.0  ;;  %v619_v22 = vadd.f32 %v618_v15, %v2716_v3 }
 0x114   : > { %v695_v12 = vmax.f32 %v504_v4, 0.0  ;;  %v697_v50 = vmax.f32 %v617_v14, 0.0 }
 0x115   : > { %v696_v19 = vmax.f32 %v506_v8, 0.0  ;;  %v698_v59 = vmax.f32 %v619_v22, 0.0 }
 0x116   : > { %v755_v45 = vpack.c.bf16 %v695_v12, %v691_v11  ;;  %v2725_v2 = vpack.c.bf16 %v697_v50, %v693_v13 }
 0x117   : > { %v756_v55 = vpack.c.bf16 %v696_v19, %v692_v18  ;;  %v509_v58 = vpop.f32.mrb[4].mxu0  ;;  %v2728_v5 = vpack.c.bf16 %v698_v59, %v694_v21  ;;  %v622_v63 = vpop.f32.mrb[4].mxu1 }
 0x118   : > { %v510_v61 = vadd.f32 %v509_v58, %v2704_v52  ;;  %v511_v1 = vpop.f32.mrb[5].mxu0  ;;  %v623_v8 = vadd.f32 %v622_v63, %v2713_v62  ;;  %v624_v9 = vpop.f32.mrb[5].mxu1 }
 0x119   : > { %v512_v60 = vadd.f32 %v511_v1, %v2709_v56  ;;  %v513_v4 = vpop.f32.mrb[6].mxu0  ;;  %1215 = vmatprep.mubr.bf16.mxu0 %v756_v55  ;;  %v625_v11 = vadd.f32 %v624_v9, %v2716_v3  ;;  %v626_v12 = vpop.f32.mrb[6].mxu1 }
 0x11a   : > { %v514_v6 = vadd.f32 %v513_v4, %v2704_v52  ;;  %v515_v7 = vpop.f32.mrb[7].mxu0  ;;  %1216 = vmatmul.mubr.bf16.vlgmr.msra.gmra.mrb[32].mxu0 %v755_v45  ;;  %v699_v13 = vmax.f32 %v510_v61, 0.0  ;;  %v701_v15 = vmax.f32 %v623_v8, 0.0  ;;  %v627_v18 = vadd.f32 %v626_v12, %v2713_v62  ;;  %v628_v19 = vpop.f32.mrb[7].mxu1 }
 0x11b   : > { %v516_v10 = vadd.f32 %v515_v7, %v2709_v56  ;;  %1297 = vmatpush1.bf16.msra.mxu0 %v2565_v34  ;;  %v700_v21 = vmax.f32 %v512_v60, 0.0  ;;  %v702_v45 = vmax.f32 %v625_v11, 0.0  ;;  %v629_v50 = vadd.f32 %v628_v19, %v2716_v3 }
 0x11c   : > { %v703_v14 = vmax.f32 %v514_v6, 0.0  ;;  %1298 = vmatprep.subr.bf16.mxu0 %v2571_v37  ;;  %v705_v58 = vmax.f32 %v627_v18, 0.0 }
 0x11d   : > { %v704_v22 = vmax.f32 %v516_v10, 0.0  ;;  %v706_v1 = vmax.f32 %v629_v50, 0.0 }
 0x11e   : > { %v759_v55 = vpack.c.bf16 %v703_v14, %v699_v13  ;;  %v2741_v37 = vpack.c.bf16 %v705_v58, %v701_v15 }
 0x11f   : > { %v760_v59 = vpack.c.bf16 %v704_v22, %v700_v21  ;;  %1299 = vmatpush1.bf16.msra.mxu0 %v2577_v41  ;;  %v519_v34 = vpop.f32.mrb[8].mxu0  ;;  %v2744_v6 = vpack.c.bf16 %v706_v1, %v702_v45  ;;  %v632_v7 = vpop.f32.mrb[8].mxu1 }
 0x120   : > { %v520_v61 = vadd.f32 %v519_v34, %v2704_v52  ;;  %v521_v4 = vpop.f32.mrb[9].mxu0  ;;  %1300 = vmatprep.subr.bf16.mxu0 %v2581_v43  ;;  %v633_v41 = vadd.f32 %v632_v7, %v2713_v62  ;;  %v634_v10 = vpop.f32.mrb[9].mxu1 }
 0x121   : > { %v522_v60 = vadd.f32 %v521_v4, %v2709_v56  ;;  %v523_v63 = vpop.f32.mrb[10].mxu0  ;;  %1225 = vmatprep.mubr.bf16.mxu0 %v760_v59  ;;  %v635_v43 = vadd.f32 %v634_v10, %v2716_v3  ;;  %v636_v12 = vpop.f32.mrb[10].mxu1 }
 0x122   : > { %v524_v8 = vadd.f32 %v523_v63, %v2704_v52  ;;  %v525_v9 = vpop.f32.mrb[11].mxu0  ;;  %1226 = vmatmul.mubr.bf16.gmra.mrb[36].mxu0 %v759_v55  ;;  %v707_v13 = vmax.f32 %v520_v61, 0.0  ;;  %v709_v15 = vmax.f32 %v633_v41, 0.0  ;;  %v637_v18 = vadd.f32 %v636_v12, %v2713_v62  ;;  %v638_v19 = vpop.f32.mrb[11].mxu1 }
 0x123   : > { %v526_v11 = vadd.f32 %v525_v9, %v2709_v56  ;;  %1301 = vmatpush1.bf16.msra.mxu0 %v2586_v47  ;;  %v708_v21 = vmax.f32 %v522_v60, 0.0  ;;  %v710_v45 = vmax.f32 %v635_v43, 0.0  ;;  %v639_v50 = vadd.f32 %v638_v19, %v2716_v3 }
 0x124   : > { %v711_v14 = vmax.f32 %v524_v8, 0.0  ;;  %1302 = vmatprep.subr.bf16.mxu0 %v2589_v49  ;;  %v713_v58 = vmax.f32 %v637_v18, 0.0 }
 0x125   : > { %v712_v22 = vmax.f32 %v526_v11, 0.0  ;;  %v714_v34 = vmax.f32 %v639_v50, 0.0 }
 0x126   : > { %v763_v55 = vpack.c.bf16 %v711_v14, %v707_v13  ;;  %v2757_v49 = vpack.c.bf16 %v713_v58, %v709_v15 }
 0x127   : > { %v764_v59 = vpack.c.bf16 %v712_v22, %v708_v21  ;;  %1303 = vmatpush1.bf16.msra.mxu0 %v2593_v53  ;;  %v529_v47 = vpop.f32.mrb[12].mxu0  ;;  %v2760_v63 = vpack.c.bf16 %v714_v34, %v710_v45  ;;  %v642_v7 = vpop.f32.mrb[12].mxu1 }
 0x128   : > { %v530_v1 = vadd.f32 %v529_v47, %v2704_v52  ;;  %v531_v61 = vpop.f32.mrb[13].mxu0  ;;  %1304 = vmatprep.subr.bf16.mxu0 %v2595_v54  ;;  %v643_v53 = vadd.f32 %v642_v7, %v2713_v62  ;;  %v644_v41 = vpop.f32.mrb[13].mxu1 }
 0x129   : > { %v532_v4 = vadd.f32 %v531_v61, %v2709_v56  ;;  %v533_v60 = vpop.f32.mrb[14].mxu0  ;;  %1235 = vmatprep.mubr.bf16.mxu0 %v764_v59  ;;  %v645_v54 = vadd.f32 %v644_v41, %v2716_v3  ;;  %v646_v11 = vpop.f32.mrb[14].mxu1 }
 0x12a   : > { %v534_v8 = vadd.f32 %v533_v60, %v2704_v52  ;;  %v535_v9 = vpop.f32.mrb[15].mxu0  ;;  %1236 = vmatmul.mubr.bf16.gmra.mrb[40].mxu0 %v763_v55  ;;  %v715_v43 = vmax.f32 %v530_v1, 0.0  ;;  %v717_v13 = vmax.f32 %v643_v53, 0.0  ;;  %v647_v14 = vadd.f32 %v646_v11, %v2713_v62  ;;  %v648_v15 = vpop.f32.mrb[15].mxu1 }
 0x12b   : > { %v536_v10 = vadd.f32 %v535_v9, %v2709_v56  ;;  %1305 = vmatpush1.bf16.msra.mxu0 %v2602_v57  ;;  %v716_v18 = vmax.f32 %v532_v4, 0.0  ;;  %v718_v21 = vmax.f32 %v645_v54, 0.0  ;;  %v649_v22 = vadd.f32 %v648_v15, %v2716_v3 }
 0x12c   : > { %v719_v12 = vmax.f32 %v534_v8, 0.0  ;;  %1306 = vmatprep.subr.bf16.mxu0 %v2628_v16  ;;  %v721_v50 = vmax.f32 %v647_v14, 0.0 }
 0x12d   : > { %v720_v19 = vmax.f32 %v536_v10, 0.0  ;;  %v722_v58 = vmax.f32 %v649_v22, 0.0 }
 0x12e   : > { %v767_v45 = vpack.c.bf16 %v719_v12, %v715_v43  ;;  %v2772_v47 = vpack.c.bf16 %v721_v50, %v717_v13 }
 0x12f   : > { %v768_v55 = vpack.c.bf16 %v720_v19, %v716_v18  ;;  %1307 = vmatpush1.bf16.msra.mxu0 %v2630_v17  ;;  %v539_v57 = vpop.f32.mrb[16].mxu0  ;;  %v2776_v1 = vpack.c.bf16 %v722_v58, %v718_v21  ;;  %v652_v4 = vpop.f32.mrb[16].mxu1 }
 0x130   : > { %v540_v59 = vadd.f32 %v539_v57, %v2704_v52  ;;  %v541_v16 = vpop.f32.mrb[17].mxu0  ;;  %1308 = vmatprep.subr.bf16.mxu0 %v2634_v20  ;;  %v653_v17 = vadd.f32 %v652_v4, %v2713_v62  ;;  %v654_v8 = vpop.f32.mrb[17].mxu1 }
 0x131   : > { %v542_v34 = vadd.f32 %v541_v16, %v2709_v56  ;;  %v543_v61 = vpop.f32.mrb[18].mxu0  ;;  %1245 = vmatprep.mubr.bf16.mxu0 %v768_v55  ;;  %v655_v53 = vadd.f32 %v654_v8, %v2716_v3  ;;  %v656_v20 = vpop.f32.mrb[18].mxu1 }
 0x132   : > { %v544_v60 = vadd.f32 %v543_v61, %v2704_v52  ;;  %v545_v7 = vpop.f32.mrb[19].mxu0  ;;  %1246 = vmatmul.mubr.bf16.gmra.mrb[44].mxu0 %v767_v45  ;;  %v723_v41 = vmax.f32 %v540_v59, 0.0  ;;  %v725_v54 = vmax.f32 %v653_v17, 0.0  ;;  %v657_v11 = vadd.f32 %v656_v20, %v2713_v62  ;;  %v658_v43 = vpop.f32.mrb[19].mxu1 }
 0x133   : > { %v546_v9 = vadd.f32 %v545_v7, %v2709_v56  ;;  %1309 = vmatpush1.bf16.msra.mxu0 %v2636_v0  ;;  %v724_v12 = vmax.f32 %v542_v34, 0.0  ;;  %v726_v14 = vmax.f32 %v655_v53, 0.0  ;;  %v659_v15 = vadd.f32 %v658_v43, %v2716_v3 }
 0x134   : > { %v727_v10 = vmax.f32 %v544_v60, 0.0  ;;  %1310 = vmatprep.subr.bf16.mxu0 %v2640_v23  ;;  %v729_v19 = vmax.f32 %v657_v11, 0.0 }
 0x135   : > { %v728_v13 = vmax.f32 %v546_v9, 0.0  ;;  %v730_v22 = vmax.f32 %v659_v15, 0.0 }
 0x136   : > { %v771_v18 = vpack.c.bf16 %v727_v10, %v723_v41  ;;  %v773_v45 = vpack.c.bf16 %v729_v19, %v725_v54 }
 0x137   : > { %v772_v21 = vpack.c.bf16 %v728_v13, %v724_v12  ;;  %1311 = vmatpush1.bf16.msra.mxu0 %v2642_v24  ;;  %v549_v0 = vpop.f32.mrb[20].mxu0  ;;  %v774_v57 = vpack.c.bf16 %v730_v22, %v726_v14  ;;  %v662_v59 = vpop.f32.mrb[20].mxu1 }
 0x138   : > { %v550_v50 = vadd.f32 %v549_v0, %v2704_v52  ;;  %v551_v55 = vpop.f32.mrb[21].mxu0  ;;  %1312 = vmatprep.subr.bf16.mxu0 %v2647_v25  ;;  %v663_v34 = vadd.f32 %v662_v59, %v2713_v62  ;;  %v664_v4 = vpop.f32.mrb[21].mxu1 }
 0x139   : > { %v552_v23 = vadd.f32 %v551_v55, %v2709_v56  ;;  %v553_v58 = vpop.f32.mrb[22].mxu0  ;;  %1255 = vmatprep.mubr.bf16.mxu0 %v772_v21  ;;  %v665_v60 = vadd.f32 %v664_v4, %v2716_v3  ;;  %v666_v25 = vpop.f32.mrb[22].mxu1  ;;  %1368 = vmatprep.mubr.bf16.mxu1 %v774_v57 }
 0x13a   : > { %v554_v16 = vadd.f32 %v553_v58, %v2704_v52  ;;  %v555_v61 = vpop.f32.mrb[23].mxu0  ;;  %1256 = vmatmul.mubr.bf16.gmra.mrb[48].mxu0 %v771_v18  ;;  %v731_v17 = vmax.f32 %v550_v50, 0.0  ;;  %v733_v8 = vmax.f32 %v663_v34, 0.0  ;;  %v667_v9 = vadd.f32 %v666_v25, %v2713_v62  ;;  %v668_v53 = vpop.f32.mrb[23].mxu1  ;;  %1369 = vmatmul.mubr.bf16.vlgmr.msra.gmra.mrb[32].mxu1 %v773_v45 }
 0x13b   : > { %v556_v24 = vadd.f32 %v555_v61, %v2709_v56  ;;  %1313 = vmatpush1.bf16.msra.mxu0 %v2649_v26  ;;  %v732_v20 = vmax.f32 %v552_v23, 0.0  ;;  %v734_v10 = vmax.f32 %v665_v60, 0.0  ;;  %v669_v54 = vadd.f32 %v668_v53, %v2716_v3 }
 0x13c   : > { %v735_v7 = vmax.f32 %v554_v16, 0.0  ;;  %1314 = vmatprep.subr.bf16.mxu0 %v2653_v27  ;;  %v737_v43 = vmax.f32 %v667_v9, 0.0 }
 0x13d   : > { %v736_v41 = vmax.f32 %v556_v24, 0.0  ;;  %v738_v26 = vmax.f32 %v669_v54, 0.0 }
 0x13e   : > { %v775_v11 = vpack.c.bf16 %v735_v7, %v731_v17  ;;  %v777_v14 = vpack.c.bf16 %v737_v43, %v733_v8 }
 0x13f   : > { %v776_v12 = vpack.c.bf16 %v736_v41, %v732_v20  ;;  %1315 = vmatpush1.bf16.msra.mxu0 %v2655_v28  ;;  %v559_v13 = vpop.f32.mrb[24].mxu0  ;;  %v778_v19 = vpack.c.bf16 %v738_v26, %v734_v10  ;;  %v672_v22 = vpop.f32.mrb[24].mxu1 }
 0x140   : > { %v560_v15 = vadd.f32 %v559_v13, %v2704_v52  ;;  %v561_v18 = vpop.f32.mrb[25].mxu0  ;;  %1316 = vmatprep.subr.bf16.mxu0 %v2659_v29  ;;  %v673_v45 = vadd.f32 %v672_v22, %v2713_v62  ;;  %v674_v55 = vpop.f32.mrb[25].mxu1 }
 0x141   : > { %v562_v27 = vadd.f32 %v561_v18, %v2709_v56  ;;  %v563_v21 = vpop.f32.mrb[26].mxu0  ;;  %1265 = vmatprep.mubr.bf16.mxu0 %v776_v12  ;;  %v675_v57 = vadd.f32 %v674_v55, %v2716_v3  ;;  %v676_v29 = vpop.f32.mrb[26].mxu1  ;;  %1378 = vmatprep.mubr.bf16.mxu1 %v778_v19 }
 0x142   : > { %v564_v0 = vadd.f32 %v563_v21, %v2704_v52  ;;  %v565_v50 = vpop.f32.mrb[27].mxu0  ;;  %1266 = vmatmul.mubr.bf16.gmra.mrb[52].mxu0 %v775_v11  ;;  %v739_v23 = vmax.f32 %v560_v15, 0.0  ;;  %v741_v59 = vmax.f32 %v673_v45, 0.0  ;;  %v677_v16 = vadd.f32 %v676_v29, %v2713_v62  ;;  %v678_v34 = vpop.f32.mrb[27].mxu1  ;;  %1379 = vmatmul.mubr.bf16.gmra.mrb[36].mxu1 %v777_v14 }
 0x143   : > { %v566_v28 = vadd.f32 %v565_v50, %v2709_v56  ;;  %1317 = vmatpush1.bf16.msra.mxu0 %v2661_v30  ;;  %v740_v61 = vmax.f32 %v562_v27, 0.0  ;;  %v742_v24 = vmax.f32 %v675_v57, 0.0  ;;  %v679_v60 = vadd.f32 %v678_v34, %v2716_v3  ;;  %v851_v57 = vld [vmem:[%s2992_s4] sm:$0x3] }
 0x144   : > { %v743_v58 = vmax.f32 %v564_v0, 0.0  ;;  %1318 = vmatprep.subr.bf16.mxu0 %v2665_v31  ;;  %v745_v17 = vmax.f32 %v677_v16, 0.0  ;;  %v2888_v29 = vrot.slane %v851_v57, %v342_v48 }
 0x145   : > { %v744_v4 = vmax.f32 %v566_v28, 0.0  ;;  %v746_v30 = vmax.f32 %v679_v60, 0.0 }
 0x146   : > { %v779_v25 = vpack.c.bf16 %v743_v58, %v739_v23  ;;  %v781_v9 = vpack.c.bf16 %v745_v17, %v741_v59  ;;  %v2892_v23 = vrot.slane %v851_v57, %v346_v51 }
 0x147   : > { %v780_v7 = vpack.c.bf16 %v744_v4, %v740_v61  ;;  %1319 = vmatpush1.bf16.msra.mxu0 %v2667_v32  ;;  %v569_v8 = vpop.f32.mrb[28].mxu0  ;;  %v782_v41 = vpack.c.bf16 %v746_v30, %v742_v24  ;;  %v682_v54 = vpop.f32.mrb[28].mxu1 }
 0x148   : > { %v570_v53 = vadd.f32 %v569_v8, %v2704_v52  ;;  %v571_v20 = vpop.f32.mrb[29].mxu0  ;;  %1320 = vmatprep.subr.bf16.mxu0 %v2671_v33  ;;  %v683_v43 = vadd.f32 %v682_v54, %v2713_v62  ;;  %v684_v26 = vpop.f32.mrb[29].mxu1 }
 0x149   : > { %v572_v31 = vadd.f32 %v571_v20, %v2709_v56  ;;  %v573_v10 = vpop.f32.mrb[30].mxu0  ;;  %1275 = vmatprep.mubr.bf16.mxu0 %v780_v7  ;;  %v685_v13 = vadd.f32 %v684_v26, %v2716_v3  ;;  %v686_v33 = vpop.f32.mrb[30].mxu1  ;;  %1388 = vmatprep.mubr.bf16.mxu1 %v782_v41 }
 0x14a   : > { %v574_v11 = vadd.f32 %v573_v10, %v2704_v52  ;;  %v575_v12 = vpop.f32.mrb[31].mxu0  ;;  %1276 = vmatmul.mubr.bf16.gmra.mrb[56].mxu0 %v779_v25  ;;  %v747_v14 = vmax.f32 %v570_v53, 0.0  ;;  %v749_v18 = vmax.f32 %v683_v43, 0.0  ;;  %v687_v19 = vadd.f32 %v686_v33, %v2713_v62  ;;  %v688_v27 = vpop.f32.mrb[31].mxu1  ;;  %1389 = vmatmul.mubr.bf16.gmra.mrb[40].mxu1 %v781_v9  ;;  %v2350_v62 = vld [vmem:[%s2993_s5 + $0x58] sm:$0xff]  }
 0x14b   : > { %v576_v32 = vadd.f32 %v575_v12, %v2709_v56  ;;  %1321 = vmatpush1.bf16.msra.mxu0 %v2673_v35  ;;  %v748_v52 = vmax.f32 %v572_v31, 0.0  ;;  %v750_v22 = vmax.f32 %v685_v13, 0.0  ;;  %v689_v56 = vadd.f32 %v688_v27, %v2716_v3  ;;  %v2351_v3 = vld [vmem:[%s2993_s5 + $0x18] sm:$0xff]  }
 0x14c   : > { %v751_v15 = vmax.f32 %v574_v11, 0.0  ;;  %1322 = vmatprep.subr.bf16.mxu0 %v2677_v36  ;;  %v753_v45 = vmax.f32 %v687_v19, 0.0  ;;  %v2344_v36 = vld [vmem:[%s2993_s5 + $0x40] sm:$0xff]  }
 0x14d   : > { %v752_v21 = vmax.f32 %v576_v32, 0.0  ;;  %v754_v35 = vmax.f32 %v689_v56, 0.0  ;;  %2042 = vmatprep.subr.bf16.mxu1 %v2344_v36 }
 0x14e   : > { %v783_v0 = vpack.c.bf16 %v751_v15, %v747_v14  ;;  %v785_v55 = vpack.c.bf16 %v753_v45, %v749_v18 }
 0x14f   : > { %v784_v50 = vpack.c.bf16 %v752_v21, %v748_v52  ;;  %1323 = vmatpush1.bf16.msra.mxu0 %v2679_v38  ;;  %v786_v28 = vpack.c.bf16 %v754_v35, %v750_v22  ;;  %v2345_v38 = vld [vmem:[%s2993_s5] sm:$0xff]  }
 0x150   : > { %1324 = vmatprep.subr.bf16.mxu0 %v2683_v39  ;;  %2043 = vmatpush3.bf16.msra.mxu1 %v2345_v38  ;;  %v2346_v39 = vld [vmem:[%s2993_s5 + $0x48] sm:$0xff]  }
 0x151   : > { %1285 = vmatprep.mubr.bf16.mxu0 %v784_v50  ;;  %1398 = vmatprep.mubr.bf16.mxu1 %v786_v28 }
 0x152   : > { %1286 = vmatmul.mubr.bf16.gmra.mrb[60].mxu0 %v783_v0  ;;  %1399 = vmatmul.mubr.bf16.gmra.mrb[44].mxu1 %v785_v55 }
 0x153   : > { %1325 = vmatpush1.bf16.msra.mxu0 %v2685_v40  ;;  %1328 = vmatprep.mubr.bf16.mxu0 %v2728_v5  ;;  %v2347_v40 = vld [vmem:[%s2993_s5 + $0x8] sm:$0xff]   ;;  %v2353_v5 = vld [vmem:[%s2993_s5 + $0x20] sm:$0xff]  }
 0x154   : > { %1326 = vmatprep.subr.bf16.mxu0 %v2689_v42  ;;  %2044 = vmatprep.subr.bf16.mxu1 %v2346_v39  ;;  %v2348_v42 = vld [vmem:[%s2993_s5 + $0x50] sm:$0xff]  }
 0x155   : > { %2045 = vmatpush3.bf16.msra.mxu1 %v2347_v40 }
 0x156   : > { %2046 = vmatprep.subr.bf16.mxu1 %v2348_v42 }
 0x157   : > { %1327 = vmatpush1.bf16.msra.mxu0 %v2691_v44  ;;  %v2349_v44 = vld [vmem:[%s2993_s5 + $0x10] sm:$0xff]  }
 0x159   : > { %2047 = vmatpush3.bf16.msra.mxu1 %v2349_v44 }
 0x15a   : > { %1329 = vmatmul.mubr.bf16.vlgmr.msra.gmra.mrb[32].mxu0 %v2725_v2  ;;  %2048 = vmatprep.subr.bf16.mxu1 %v2350_v62  ;;  %v2352_v2 = vld [vmem:[%s2993_s5 + $0x60] sm:$0xff]  }
 0x15b   : > { %1338 = vmatprep.mubr.bf16.mxu0 %v2744_v6  ;;  %v2355_v6 = vld [vmem:[%s2993_s5 + $0x28] sm:$0xff]  }
 0x15d   : > { %2049 = vmatpush3.bf16.msra.mxu1 %v2351_v3 }
 0x15e   : > { %2050 = vmatprep.subr.bf16.mxu1 %v2352_v2 }
 0x161   : > { %2051 = vmatpush3.bf16.msra.mxu1 %v2353_v5 }
 0x162   : > { %1339 = vmatmul.mubr.bf16.gmra.mrb[36].mxu0 %v2741_v37  ;;  %v2354_v37 = vld [vmem:[%s2993_s5 + $0x68] sm:$0xff]  }
 0x163   : > { %1348 = vmatprep.mubr.bf16.mxu0 %v2760_v63  ;;  %2052 = vmatprep.subr.bf16.mxu1 %v2354_v37  ;;  %v2357_v63 = vld [vmem:[%s2993_s5 + $0x30] sm:$0xff]  }
 0x165   : > { %2053 = vmatpush3.bf16.msra.mxu1 %v2355_v6 }
 0x16a   : > { %1349 = vmatmul.mubr.bf16.gmra.mrb[40].mxu0 %v2757_v49  ;;  %v2356_v49 = vld [vmem:[%s2993_s5 + $0x70] sm:$0xff]  }
 0x16b   : > { %1358 = vmatprep.mubr.bf16.mxu0 %v2776_v1  ;;  %2054 = vmatprep.subr.bf16.mxu1 %v2356_v49  ;;  %v2359_v1 = vld [vmem:[%s2993_s5 + $0x38] sm:$0xff]  }
 0x16c   : > { %2055 = vmatpush3.bf16.msra.mxu1 %v2357_v63 }
 0x172   : > { %1359 = vmatmul.mubr.bf16.gmra.mrb[44].mxu0 %v2772_v47  ;;  %v2358_v47 = vld [vmem:[%s2993_s5 + $0x78] sm:$0xff]  }
 0x173   : > { %2056 = vmatprep.subr.bf16.mxu1 %v2358_v47 }
 0x174   : > { %2057 = vmatpush3.bf16.msra.mxu1 %v2359_v1 }
 0x20d   : > { %v1257_v58 = vpop.f32.mrb[48].mxu0  ;;  %v1370_v4 = vpop.f32.mrb[32].mxu1 }
 0x20e   : > { %v1258_v59 = vadd.f32 %v1257_v58, %v2888_v29  ;;  %v1259_v16 = vpop.f32.mrb[49].mxu0  ;;  %v1372_v17 = vpop.f32.mrb[33].mxu1 }
 0x20f   : > { %v1260_v34 = vadd.f32 %v1259_v16, %v2892_v23  ;;  %v1261_v61 = vpop.f32.mrb[50].mxu0  ;;  %v1374_v30 = vpop.f32.mrb[34].mxu1 }
 0x210   : > { %v1262_v24 = vadd.f32 %v1261_v61, %v2888_v29  ;;  %v1371_v60 = vadd.f32 %v1370_v4, %v1258_v59  ;;  %v1263_v25 = vpop.f32.mrb[51].mxu0  ;;  %v1376_v51 = vpop.f32.mrb[35].mxu1 }
 0x211   : > { %v1264_v48 = vadd.f32 %v1263_v25, %v2892_v23  ;;  %v1373_v7 = vadd.f32 %v1372_v17, %v1260_v34 }
 0x212   : > { %v1375_v46 = vadd.f32 %v1374_v30, %v1262_v24  ;;  %v1425_v9 = vmax.f32 %v1371_v60, 0.0 }
 0x213   : > { %v1377_v8 = vadd.f32 %v1376_v51, %v1264_v48  ;;  %v1426_v20 = vmax.f32 %v1373_v7, 0.0 }
 0x214   : > { %v1427_v53 = vmax.f32 %v1375_v46, 0.0 }
 0x215   : > { %v1428_v41 = vmax.f32 %v1377_v8, 0.0  ;;  %v1267_v31 = vpop.f32.mrb[52].mxu0  ;;  %v1380_v32 = vpop.f32.mrb[36].mxu1 }
 0x216   : > { %v2898_v10 = vpack.c.bf16 %v1427_v53, %v1425_v9  ;;  %v1268_v54 = vadd.f32 %v1267_v31, %v2888_v29  ;;  %v1269_v11 = vpop.f32.mrb[53].mxu0  ;;  %v1382_v15 = vpop.f32.mrb[37].mxu1 }
 0x217   : > { %v2901_v43 = vpack.c.bf16 %v1428_v41, %v1426_v20  ;;  %v1270_v12 = vadd.f32 %v1269_v11, %v2892_v23  ;;  %v1271_v26 = vpop.f32.mrb[54].mxu0  ;;  %v1384_v27 = vpop.f32.mrb[38].mxu1 }
 0x218   : > { %v1272_v13 = vadd.f32 %v1271_v26, %v2888_v29  ;;  %v1381_v33 = vadd.f32 %v1380_v32, %v1268_v54  ;;  %v1273_v14 = vpop.f32.mrb[55].mxu0  ;;  %v1386_v21 = vpop.f32.mrb[39].mxu1 }
 0x219   : > { %v1274_v18 = vadd.f32 %v1273_v14, %v2892_v23  ;;  %v1383_v19 = vadd.f32 %v1382_v15, %v1270_v12 }
 0x21a   : > { %v1385_v52 = vadd.f32 %v1384_v27, %v1272_v13  ;;  %v1429_v56 = vmax.f32 %v1381_v33, 0.0 }
 0x21b   : > { %v1387_v22 = vadd.f32 %v1386_v21, %v1274_v18  ;;  %v1430_v45 = vmax.f32 %v1383_v19, 0.0 }
 0x21c   : > { %v1431_v0 = vmax.f32 %v1385_v52, 0.0 }
 0x21d   : > { %v1432_v50 = vmax.f32 %v1387_v22, 0.0  ;;  %v1277_v35 = vpop.f32.mrb[56].mxu0  ;;  %v1390_v42 = vpop.f32.mrb[40].mxu1 }
 0x21e   : > { %v2906_v55 = vpack.c.bf16 %v1431_v0, %v1429_v56  ;;  %v1278_v28 = vadd.f32 %v1277_v35, %v2888_v29  ;;  %v1279_v36 = vpop.f32.mrb[57].mxu0  ;;  %v1392_v2 = vpop.f32.mrb[41].mxu1 }
 0x21f   : > { %v2909_v38 = vpack.c.bf16 %v1432_v50, %v1430_v45  ;;  %v1280_v39 = vadd.f32 %v1279_v36, %v2892_v23  ;;  %v1281_v40 = vpop.f32.mrb[58].mxu0  ;;  %v1394_v6 = vpop.f32.mrb[42].mxu1 }
 0x220   : > { %v1282_v44 = vadd.f32 %v1281_v40, %v2888_v29  ;;  %v1391_v62 = vadd.f32 %v1390_v42, %v1278_v28  ;;  %v1283_v3 = vpop.f32.mrb[59].mxu0  ;;  %v1396_v63 = vpop.f32.mrb[43].mxu1 }
 0x221   : > { %v1284_v5 = vadd.f32 %v1283_v3, %v2892_v23  ;;  %v1393_v37 = vadd.f32 %v1392_v2, %v1280_v39 }
 0x222   : > { %v1395_v49 = vadd.f32 %v1394_v6, %v1282_v44  ;;  %v1433_v1 = vmax.f32 %v1391_v62, 0.0 }
 0x223   : > { %v1397_v47 = vadd.f32 %v1396_v63, %v1284_v5  ;;  %v1434_v58 = vmax.f32 %v1393_v37, 0.0 }
 0x224   : > { %v1435_v57 = vmax.f32 %v1395_v49, 0.0 }
 0x225   : > { %v1436_v59 = vmax.f32 %v1397_v47, 0.0  ;;  %v1287_v16 = vpop.f32.mrb[60].mxu0  ;;  %v1400_v17 = vpop.f32.mrb[44].mxu1 }
 0x226   : > { %v2914_v34 = vpack.c.bf16 %v1435_v57, %v1433_v1  ;;  %v1288_v61 = vadd.f32 %v1287_v16, %v2888_v29  ;;  %v1289_v4 = vpop.f32.mrb[61].mxu0  ;;  %v1402_v46 = vpop.f32.mrb[45].mxu1 }
 0x227   : > { %v2917_v24 = vpack.c.bf16 %v1436_v59, %v1434_v58  ;;  %v1290_v60 = vadd.f32 %v1289_v4, %v2892_v23  ;;  %v1291_v25 = vpop.f32.mrb[62].mxu0  ;;  %v1404_v9 = vpop.f32.mrb[46].mxu1 }
 0x228   : > { %v1292_v48 = vadd.f32 %v1291_v25, %v2888_v29  ;;  %v1401_v7 = vadd.f32 %v1400_v17, %v1288_v61  ;;  %v1293_v30 = vpop.f32.mrb[63].mxu0  ;;  %v1406_v20 = vpop.f32.mrb[47].mxu1 }
 0x229   : > { %v1294_v51 = vadd.f32 %v1293_v30, %v2892_v23  ;;  %v1403_v8 = vadd.f32 %v1402_v46, %v1290_v60 }
 0x22a   : > { %v1405_v53 = vadd.f32 %v1404_v9, %v1292_v48  ;;  %v1437_v31 = vmax.f32 %v1401_v7, 0.0 }
 0x22b   : > { %v1407_v41 = vadd.f32 %v1406_v20, %v1294_v51  ;;  %v1438_v11 = vmax.f32 %v1403_v8, 0.0 }
 0x22c   : > { %v1439_v54 = vmax.f32 %v1405_v53, 0.0 }
 0x22d   : > { %v1440_v12 = vmax.f32 %v1407_v41, 0.0  ;;  %v1330_v26 = vpop.f32.mrb[32].mxu0 }
 0x22e   : > { %v2922_v32 = vpack.c.bf16 %v1439_v54, %v1437_v31  ;;  %v2138_v13 = vadd.f32 %v1330_v26, %v2888_v29  ;;  %v1332_v33 = vpop.f32.mrb[33].mxu0 }
 0x22f   : > { %v2925_v14 = vpack.c.bf16 %v1440_v12, %v1438_v11  ;;  %v2139_v15 = vadd.f32 %v1332_v33, %v2892_v23  ;;  %v1334_v18 = vpop.f32.mrb[34].mxu0 }
 0x230   : > { %v2140_v19 = vadd.f32 %v1334_v18, %v2888_v29  ;;  %v1336_v27 = vpop.f32.mrb[35].mxu0  ;;  %v1409_v21 = vmax.f32 %v2138_v13, 0.0 }
 0x231   : > { %v2141_v52 = vadd.f32 %v1336_v27, %v2892_v23  ;;  %v1410_v56 = vmax.f32 %v2139_v15, 0.0 }
 0x232   : > { %v1411_v22 = vmax.f32 %v2140_v19, 0.0 }
 0x233   : > { %v1412_v0 = vmax.f32 %v2141_v52, 0.0 }
 0x234   : > { %v1441_v45 = vpack.c.bf16 %v1411_v22, %v1409_v21 }
 0x235   : > { %v1442_v50 = vpack.c.bf16 %v1412_v0, %v1410_v56  ;;  %v1340_v35 = vpop.f32.mrb[36].mxu0 }
 0x236   : > { %v2142_v28 = vadd.f32 %v1340_v35, %v2888_v29  ;;  %v1342_v36 = vpop.f32.mrb[37].mxu0 }
 0x237   : > { %v2143_v39 = vadd.f32 %v1342_v36, %v2892_v23  ;;  %v1344_v40 = vpop.f32.mrb[38].mxu0  ;;  %1624 = vmatprep.mubr.bf16.mxu1 %v1442_v50 }
 0x238   : > { %v2144_v42 = vadd.f32 %v1344_v40, %v2888_v29  ;;  %v1346_v44 = vpop.f32.mrb[39].mxu0  ;;  %1625 = vmatmul.mubr.bf16.vlgmr.msra.gmra.mrb[48].mxu1 %v1441_v45  ;;  %v1413_v3 = vmax.f32 %v2142_v28, 0.0 }
 0x239   : > { %v2145_v62 = vadd.f32 %v1346_v44, %v2892_v23  ;;  %v1414_v5 = vmax.f32 %v2143_v39, 0.0 }
 0x23a   : > { %v1415_v2 = vmax.f32 %v2144_v42, 0.0 }
 0x23b   : > { %v1416_v37 = vmax.f32 %v2145_v62, 0.0 }
 0x23c   : > { %v1443_v6 = vpack.c.bf16 %v1415_v2, %v1413_v3 }
 0x23d   : > { %v1444_v49 = vpack.c.bf16 %v1416_v37, %v1414_v5  ;;  %v1350_v63 = vpop.f32.mrb[40].mxu0 }
 0x23e   : > { %v2146_v47 = vadd.f32 %v1350_v63, %v2888_v29  ;;  %v1352_v1 = vpop.f32.mrb[41].mxu0 }
 0x23f   : > { %v2147_v57 = vadd.f32 %v1352_v1, %v2892_v23  ;;  %v1354_v58 = vpop.f32.mrb[42].mxu0  ;;  %1632 = vmatprep.mubr.bf16.mxu1 %v1444_v49 }
 0x240   : > { %v2148_v59 = vadd.f32 %v1354_v58, %v2888_v29  ;;  %v1356_v16 = vpop.f32.mrb[43].mxu0  ;;  %1633 = vmatmul.mubr.bf16.gmra.mrb[52].mxu1 %v1443_v6  ;;  %v1417_v4 = vmax.f32 %v2146_v47, 0.0 }
 0x241   : > { %v2149_v61 = vadd.f32 %v1356_v16, %v2892_v23  ;;  %v1418_v25 = vmax.f32 %v2147_v57, 0.0 }
 0x242   : > { %v1419_v60 = vmax.f32 %v2148_v59, 0.0 }
 0x243   : > { %v1420_v17 = vmax.f32 %v2149_v61, 0.0 }
 0x244   : > { %v1445_v48 = vpack.c.bf16 %v1419_v60, %v1417_v4 }
 0x245   : > { %v1446_v7 = vpack.c.bf16 %v1420_v17, %v1418_v25  ;;  %v1360_v30 = vpop.f32.mrb[44].mxu0 }
 0x246   : > { %v2150_v46 = vadd.f32 %v1360_v30, %v2888_v29  ;;  %v1362_v51 = vpop.f32.mrb[45].mxu0 }
 0x247   : > { %v2151_v8 = vadd.f32 %v1362_v51, %v2892_v23  ;;  %v1364_v9 = vpop.f32.mrb[46].mxu0  ;;  %1640 = vmatprep.mubr.bf16.mxu1 %v1446_v7 }
 0x248   : > { %v2152_v53 = vadd.f32 %v1364_v9, %v2888_v29  ;;  %v1366_v20 = vpop.f32.mrb[47].mxu0  ;;  %1641 = vmatmul.mubr.bf16.gmra.mrb[56].mxu1 %v1445_v48  ;;  %v1421_v31 = vmax.f32 %v2150_v46, 0.0 }
 0x249   : > { %v2153_v41 = vadd.f32 %v1366_v20, %v2892_v23  ;;  %v1422_v11 = vmax.f32 %v2151_v8, 0.0 }
 0x24a   : > { %v1423_v54 = vmax.f32 %v2152_v53, 0.0 }
 0x24b   : > { %v1424_v12 = vmax.f32 %v2153_v41, 0.0 }
 0x24c   : > { %v1447_v26 = vpack.c.bf16 %v1423_v54, %v1421_v31 }
 0x24d   : > { %v1448_v13 = vpack.c.bf16 %v1424_v12, %v1422_v11 }
 0x24f   : > { %1648 = vmatprep.mubr.bf16.mxu1 %v1448_v13 }
 0x250   : > { %1649 = vmatmul.mubr.bf16.gmra.mrb[60].mxu1 %v1447_v26 }
 0x251   : > { %1656 = vmatprep.mubr.bf16.mxu1 %v2901_v43 }
 0x258   : > { %1657 = vmatmul.mubr.bf16.gmra.mrb[64].mxu1 %v2898_v10  ;;  %v2953_v10 = vld [vmem:[%s2994_s6] ss:$0 sm:$0xff] }
 0x259   : > { %1664 = vmatprep.mubr.bf16.mxu1 %v2909_v38 }
 0x260   : > { %1665 = vmatmul.mubr.bf16.gmra.mrb[68].mxu1 %v2906_v55 }
 0x261   : > { %1672 = vmatprep.mubr.bf16.mxu1 %v2917_v24 }
 0x268   : > { %1673 = vmatmul.mubr.bf16.gmra.mrb[72].mxu1 %v2914_v34 }
 0x269   : > { %1680 = vmatprep.mubr.bf16.mxu1 %v2925_v14 }
 0x270   : > { %1681 = vmatmul.mubr.bf16.gmra.mrb[76].mxu1 %v2922_v32 }
 0x30b   : > { %v2058_v29 = vpop.f32.mrb[48].mxu1 }
 0x30c   : > { %v2059_v23 = vpop.f32.mrb[49].mxu1 }
 0x30d   : > { %v2060_v33 = vadd.f32 %v2059_v23, %v2058_v29  ;;  %v2061_v15 = vpop.f32.mrb[50].mxu1 }
 0x30e   : > { %v2062_v43 = vpop.f32.mrb[51].mxu1 }
 0x30f   : > { %v2063_v55 = vadd.f32 %v2062_v43, %v2061_v15  ;;  %v1627_v38 = vadd.f32 %v2060_v33, %v2953_v10 }
 0x311   : > { %v1630_v34 = vadd.f32 %v2063_v55, %v2953_v10 }
 0x313   : > { %v1998_v24 = vpack.c.bf16 %v1630_v34, %v1627_v38  ;;  %v2064_v32 = vpop.f32.mrb[52].mxu1 }
 0x314   : > { %v2065_v14 = vpop.f32.mrb[53].mxu1 }
 0x315   : > { %1999 = vst [vmem:[%s2961_s13] sm:$0xff] %v1998_v24   ;;  %v2066_v18 = vadd.f32 %v2065_v14, %v2064_v32  ;;  %v2067_v19 = vpop.f32.mrb[54].mxu1 }
 0x316   : > { %v2068_v27 = vpop.f32.mrb[55].mxu1 }
 0x317   : > { %v2069_v52 = vadd.f32 %v2068_v27, %v2067_v19  ;;  %v1635_v21 = vadd.f32 %v2066_v18, %v2953_v10 }
 0x319   : > { %v1638_v22 = vadd.f32 %v2069_v52, %v2953_v10 }
 0x31b   : > { %v2003_v56 = vpack.c.bf16 %v1638_v22, %v1635_v21  ;;  %v2070_v0 = vpop.f32.mrb[56].mxu1 }
 0x31c   : > { %v2071_v45 = vpop.f32.mrb[57].mxu1 }
 0x31d   : > { %2035 = vst [vmem:[%s2961_s13 + $0x8] sm:$0xff] %v2003_v56   ;;  %v2072_v50 = vadd.f32 %v2071_v45, %v2070_v0  ;;  %v2073_v35 = vpop.f32.mrb[58].mxu1 }
 0x31e   : > { %v2074_v28 = vpop.f32.mrb[59].mxu1 }
 0x31f   : > { %v2075_v36 = vadd.f32 %v2074_v28, %v2073_v35  ;;  %v1643_v39 = vadd.f32 %v2072_v50, %v2953_v10 }
 0x321   : > { %v1646_v40 = vadd.f32 %v2075_v36, %v2953_v10 }
 0x323   : > { %v2008_v42 = vpack.c.bf16 %v1646_v40, %v1643_v39  ;;  %v2076_v44 = vpop.f32.mrb[60].mxu1 }
 0x324   : > { %v2077_v62 = vpop.f32.mrb[61].mxu1 }
 0x325   : > { %2036 = vst [vmem:[%s2961_s13 + $0x10] sm:$0xff] %v2008_v42   ;;  %v2078_v3 = vadd.f32 %v2077_v62, %v2076_v44  ;;  %v2079_v2 = vpop.f32.mrb[62].mxu1 }
 0x326   : > { %v2080_v5 = vpop.f32.mrb[63].mxu1 }
 0x327   : > { %v2081_v37 = vadd.f32 %v2080_v5, %v2079_v2  ;;  %v1651_v6 = vadd.f32 %v2078_v3, %v2953_v10 }
 0x329   : > { %v1654_v49 = vadd.f32 %v2081_v37, %v2953_v10 }
 0x32b   : > { %v2013_v63 = vpack.c.bf16 %v1654_v49, %v1651_v6  ;;  %v2082_v47 = vpop.f32.mrb[64].mxu1 }
 0x32c   : > { %v2083_v1 = vpop.f32.mrb[65].mxu1 }
 0x32d   : > { %2037 = vst [vmem:[%s2961_s13 + $0x18] sm:$0xff] %v2013_v63   ;;  %v2084_v57 = vadd.f32 %v2083_v1, %v2082_v47  ;;  %v2085_v58 = vpop.f32.mrb[66].mxu1 }
 0x32e   : > { %v2086_v59 = vpop.f32.mrb[67].mxu1 }
 0x32f   : > { %v2087_v16 = vadd.f32 %v2086_v59, %v2085_v58  ;;  %v1659_v61 = vadd.f32 %v2084_v57, %v2953_v10 }
 0x331   : > { %v1662_v4 = vadd.f32 %v2087_v16, %v2953_v10 }
 0x333   : > { %v2018_v60 = vpack.c.bf16 %v1662_v4, %v1659_v61  ;;  %v2088_v25 = vpop.f32.mrb[68].mxu1 }
 0x334   : > { %v2089_v17 = vpop.f32.mrb[69].mxu1 }
 0x335   : > { %2038 = vst [vmem:[%s2961_s13 + $0x20] sm:$0xff] %v2018_v60   ;;  %v2090_v48 = vadd.f32 %v2089_v17, %v2088_v25  ;;  %v2091_v7 = vpop.f32.mrb[70].mxu1 }
 0x336   : > { %v2092_v30 = vpop.f32.mrb[71].mxu1 }
 0x337   : > { %v2093_v46 = vadd.f32 %v2092_v30, %v2091_v7  ;;  %v1667_v51 = vadd.f32 %v2090_v48, %v2953_v10 }
 0x339   : > { %v1670_v8 = vadd.f32 %v2093_v46, %v2953_v10 }
 0x33b   : > { %v2023_v9 = vpack.c.bf16 %v1670_v8, %v1667_v51  ;;  %v2094_v53 = vpop.f32.mrb[72].mxu1 }
 0x33c   : > { %v2095_v20 = vpop.f32.mrb[73].mxu1 }
 0x33d   : > { %2039 = vst [vmem:[%s2961_s13 + $0x28] sm:$0xff] %v2023_v9   ;;  %v2096_v41 = vadd.f32 %v2095_v20, %v2094_v53  ;;  %v2097_v31 = vpop.f32.mrb[74].mxu1 }
 0x33e   : > { %v2098_v54 = vpop.f32.mrb[75].mxu1 }
 0x33f   : > { %v2099_v11 = vadd.f32 %v2098_v54, %v2097_v31  ;;  %v1675_v12 = vadd.f32 %v2096_v41, %v2953_v10 }
 0x341   : > { %v1678_v26 = vadd.f32 %v2099_v11, %v2953_v10 }
 0x343   : > { %v2028_v13 = vpack.c.bf16 %v1678_v26, %v1675_v12  ;;  %v2100_v29 = vpop.f32.mrb[76].mxu1 }
 0x344   : > { %v2101_v23 = vpop.f32.mrb[77].mxu1 }
 0x345   : > { %2040 = vst [vmem:[%s2961_s13 + $0x30] sm:$0xff] %v2028_v13   ;;  %v2102_v33 = vadd.f32 %v2101_v23, %v2100_v29  ;;  %v2103_v15 = vpop.f32.mrb[78].mxu1 }
 0x346   : > { %v2104_v43 = vpop.f32.mrb[79].mxu1 }
 0x347   : > { %v2105_v55 = vadd.f32 %v2104_v43, %v2103_v15  ;;  %v1683_v38 = vadd.f32 %v2102_v33, %v2953_v10 }
 0x349   : > { %v1686_v34 = vadd.f32 %v2105_v55, %v2953_v10 }
 0x34b   : > { %v2033_v24 = vpack.c.bf16 %v1686_v34, %v1683_v38 }
 0x34d   : > { %2041 = vst [vmem:[%s2961_s13 + $0x38] sm:$0xff] %v2033_v24  }
 0x34e PF: > { %s18_s24 = sadd.s32 1, %s2398_s24  }
 0x34f   : > { %p15_p3 = scmp.ge.s32.totalorder %s18_s24, 4  }
 0x351   :  { %17 = sbr.rel (!%p15_p3) target bundleno = 1 (0x1), region = 83 }
 0x358   :  { %1791 = vsyncpa [#allocation3], 1 }
 0x359   :  { %1793 = vsyncpa [#allocation3 + $0x1], 1 }

</bundles_post_ra>
